<compile_context>
chip_gen: v7x
topology: tpu7x:2x2x1
jax: 0.10.0
libtpu: 0.0.40
codegen_flags: <defaults>
</compile_context>

<pallas_src>
import functools

import jax
import jax.numpy as jnp
from jax import lax
from jax.experimental import pallas as pl
from jax.experimental.pallas import tpu as pltpu


def _nsp_head_kernel(x_ref, w_ref, b_ref, o_ref):
    """One (tm, 2) output tile: o = x_tile @ W^T + b (no activation)."""
    # x_ref: [tm, H], w_ref: [2, H] (torch Linear layout) -> contract last dims of both.
    z = lax.dot_general(
        x_ref[...],
        w_ref[...],
        dimension_numbers=(((1,), (1,)), ((), ())),
        preferred_element_type=jnp.float32,
    )
    o_ref[...] = (z + b_ref[...].astype(jnp.float32)).astype(o_ref.dtype)


def _round_up(x, m):
    return ((x + m - 1) // m) * m


@functools.partial(jax.jit, static_argnames=("tm",))
def bert_only_nsp_head(pooled_output, weight, bias, *, tm=512):
    """pooled_output: [B, H]; weight: [2, H] (torch Linear layout); bias: [2]."""
    orig_shape = pooled_output.shape
    H = orig_shape[-1]
    N = weight.shape[0]  # == 2 for the NSP head

    x = pooled_output.reshape(-1, H)
    M = x.shape[0]

    # Row tile: multiple of 8 sublanes; small batches collapse to a single block.
    tm = min(tm, _round_up(M, 8))
    M_pad = _round_up(M, tm)
    if M_pad != M:
        x = jnp.pad(x, ((0, M_pad - M), (0, 0)))

    b2d = bias.reshape(1, N)

    out = pl.pallas_call(
        _nsp_head_kernel,
        out_shape=jax.ShapeDtypeStruct((M_pad, N), pooled_output.dtype),
        grid_spec=pltpu.PrefetchScalarGridSpec(
            num_scalar_prefetch=0,
            grid=(M_pad // tm,),
            in_specs=[
                pl.BlockSpec((tm, H), lambda i: (i, 0)),  # x rows tile
                pl.BlockSpec((N, H), lambda i: (0, 0)),   # full weight, torch layout
                pl.BlockSpec((1, N), lambda i: (0, 0)),   # bias row
            ],
            out_specs=pl.BlockSpec((tm, N), lambda i: (i, 0)),
        ),
        compiler_params=pltpu.CompilerParams(
            dimension_semantics=("parallel",),
        ),
    )(x, weight, b2d)

    out = out[:M]
    return out.reshape(*orig_shape[:-1], N)


def _reference(pooled_output, weight, bias):
    return pooled_output @ weight.T + bias


if __name__ == "__main__":
    # Small, BERT-like config: batch=2, hidden=32; NSP head maps hidden -> 2 classes.
    B, H = 2, 32

    key = jax.random.PRNGKey(0)
    kx, kw, kb = jax.random.split(key, 3)

    pooled_output = jax.random.normal(kx, (B, H), dtype=jnp.float32)
    # Deterministic "Linear" params in torch layout: weight [2, H], bias [2].
    weight = jax.random.normal(kw, (2, H), dtype=jnp.float32) * 0.02
    bias = jax.random.normal(kb, (2,), dtype=jnp.float32) * 0.02

    out = bert_only_nsp_head(pooled_output, weight, bias)
    out = jax.block_until_ready(out)

    ref = _reference(pooled_output, weight, bias)
    assert out.shape == (B, 2)
    assert jnp.allclose(out, ref, atol=1e-5, rtol=1e-5), "mismatch vs reference"

    print("KERNEL_OK")
</pallas_src>

<mosaic_0001>
module attributes {stable_mosaic.version = 11 : i64} {
  func.func @_nsp_head_kernel(%arg0: i32, %arg1: memref<8x32xf32, #tpu.memory_space<vmem>>, %arg2: memref<2x32xf32, #tpu.memory_space<vmem>>, %arg3: memref<1x2xf32, #tpu.memory_space<vmem>>, %arg4: memref<8x2xf32, #tpu.memory_space<vmem>>) attributes {dimension_semantics = [#tpu.dimension_semantics<parallel>], iteration_bounds = array<i64: 1>, scalar_prefetch = 0 : i64, scratch_operands = 0 : i64, tpu.core_type = #tpu.core_type<tc>, window_params = [{transform_indices = @transform_0, window_bounds = array<i64: 8, 32>}, {pipeline_mode = #tpu.pipeline_mode<synchronous>, transform_indices = @transform_1, window_bounds = array<i64: 2, 32>}, {pipeline_mode = #tpu.pipeline_mode<synchronous>, transform_indices = @transform_2, window_bounds = array<i64: 1, 2>}, {transform_indices = @transform_3, window_bounds = array<i64: 8, 2>}]} {
    %c0 = arith.constant 0 : index
    %c0_0 = arith.constant 0 : index
    %0 = vector.load %arg1[%c0, %c0_0] : memref<8x32xf32, #tpu.memory_space<vmem>>, vector<8x32xf32>
    %c0_1 = arith.constant 0 : index
    %c0_2 = arith.constant 0 : index
    %1 = vector.load %arg2[%c0_1, %c0_2] : memref<2x32xf32, #tpu.memory_space<vmem>>, vector<2x32xf32>
    %cst = arith.constant dense<0.000000e+00> : vector<8x2xf32>
    %2 = tpu.matmul %0, %1, %cst {dimension_numbers = #tpu.dot_dimension_numbers<[1], [1], [0], [0], [0, 0, 1, 0], [], []>} : vector<8x32xf32>, vector<2x32xf32>, vector<8x2xf32> -> vector<8x2xf32>
    %c0_3 = arith.constant 0 : index
    %c0_4 = arith.constant 0 : index
    %3 = vector.load %arg3[%c0_3, %c0_4] : memref<1x2xf32, #tpu.memory_space<vmem>>, vector<1x2xf32>
    %4 = vector.broadcast %3 : vector<1x2xf32> to vector<8x2xf32>
    %5 = arith.addf %2, %4 : vector<8x2xf32>
    %c0_5 = arith.constant 0 : index
    %c0_6 = arith.constant 0 : index
    %6 = vector.load %arg4[%c0_5, %c0_6] : memref<8x2xf32, #tpu.memory_space<vmem>>, vector<8x2xf32>
    tpu.vector_store %arg4[%c0_5, %c0_6], %5 {strides = array<i32>} : memref<8x2xf32, #tpu.memory_space<vmem>>, vector<8x2xf32>,
    return
  }
  func.func @transform_0(%arg0: i32) -> (i32, i32) {
    %c0_i32 = arith.constant 0 : i32
    %c0_i32_0 = arith.constant 0 : i32
    return %arg0, %c0_i32 : i32, i32
  }
  func.func @transform_1(%arg0: i32) -> (i32, i32) {
    %c0_i32 = arith.constant 0 : i32
    %c0_i32_0 = arith.constant 0 : i32
    %c0_i32_1 = arith.constant 0 : i32
    return %c0_i32, %c0_i32_0 : i32, i32
  }
  func.func @transform_2(%arg0: i32) -> (i32, i32) {
    %c0_i32 = arith.constant 0 : i32
    %c0_i32_0 = arith.constant 0 : i32
    %c0_i32_1 = arith.constant 0 : i32
    return %c0_i32, %c0_i32_0 : i32, i32
  }
  func.func @transform_3(%arg0: i32) -> (i32, i32) {
    %c0_i32 = arith.constant 0 : i32
    %c0_i32_0 = arith.constant 0 : i32
    return %arg0, %c0_i32 : i32, i32
  }
}

</mosaic_0001>

<bundles_post_ra>
// kernel: bert_only_nsp_head.1
= control target key start
LH: loop header
LB: loop body
LE: loop exit
PB: predicated region body
PF: predicated region fallthrough
CT: control target
= control target key end

     0   :  { %vm23_vm0 = vcmask 261120   ;;  %v118_v0 = vmov 0.0   ;;  %vm119_vm1 = vmmov 0   ;;  %vm100_vm2 = vcmask 15360   ;;  %s152_s1 = inlined_call_operand.vmem [shape: f32[2,32], index: 1, kind: input, shape index: {}]   ;;  %s153_s0 = inlined_call_operand.vmem [shape: f32[8,32], index: 0, kind: input, shape index: {}]   ;;  %s154_s2 = inlined_call_operand.vmem [shape: f32[1,2], index: 2, kind: input, shape index: {}]   ;;  %s155_s3 = inlined_call_operand.vmem [shape: f32[8,2], index: 3, kind: output, shape index: {}]  }
   0x1   :  { %111 = vmatprep.subr.mxu0 %v118_v0  ;;  %v15_v1 = vld [vmem:[%s152_s1] sm:$0x3]  ;;  %113 = vmatprep.mubr.msk.f32.mxu0 %vm119_vm1, %v118_v0 }
   0x2   :  { %112 = vmatpush3.xpose.msk.msra.mxu0 %vm23_vm0, %v15_v1  ;;  %v14_v2 = vld [vmem:[%s153_s0] sm:$0xff] }
   0x3   :  { %v106_v3 = vld [vmem:[%s154_s2] ss:$0 sm:$0xff] }
   0x5   :  { %114 = vmatmul.mubr.msk.f32.vlgmr.msra.gmra.mrb[0].mxu0 %vm23_vm0, %v14_v2 }
  0xd8   :  { %v96_v4 = vpop.f32.mrb[0].mxu0 }
  0xd9   :  { %v97_v5 = vadd.f32 %v106_v3, %v96_v4  ;;  %v115_v6 = vpop.f32.mrb[1].mxu0 }
  0xdb   :  { %101 = vst.msk [vmem:[%s155_s3] sm:$0xff] %vm100_vm2, %v97_v5 }

</bundles_post_ra>
